<compile_context>
chip_gen: v7x
topology: tpu7x:2x2x1
jax: 0.10.0
libtpu: 0.0.40
codegen_flags: <defaults>
</compile_context>

<pallas_src>
import functools

import jax
import jax.numpy as jnp
from jax.experimental import pallas as pl
from jax.experimental.pallas import tpu as pltpu


def _critic_kernel(x_ref, w1_ref, b1_ref, w2_ref, b2_ref, wv_ref, bv_ref, v_ref):
    """Fused critic MLP, transposed orientation: activations are (features, batch_tile)."""
    x = x_ref[...]                                                   # (D, bt)
    h1 = jnp.dot(w1_ref[...], x, preferred_element_type=jnp.float32) + b1_ref[...]
    h1 = jnp.maximum(h1, 0.0)                                        # (fc1, bt)
    h2 = jnp.dot(w2_ref[...], h1, preferred_element_type=jnp.float32) + b2_ref[...]
    h2 = jnp.maximum(h2, 0.0)                                        # (fc2, bt)
    # Value head on VPU (broadcast multiply) + sublane reduce -> (1, bt); avoids a
    # wasteful 1-column MXU pass and writes a lane-dense output row.
    v = jnp.sum(h2 * wv_ref[...], axis=0, keepdims=True) + bv_ref[...]
    v_ref[...] = v.astype(v_ref.dtype)


@functools.partial(jax.jit, static_argnames=("batch_tile",))
def critic_forward(state, w1, b1, w2, b2, wv, bv, *, batch_tile=256):
    """Pallas forward pass of CriticNetwork.

    state: (B, input_dims) float32
    Weights in PyTorch nn.Linear layout:
      w1: (fc1, input_dims), b1: (fc1,)
      w2: (fc2, fc1),        b2: (fc2,)
      wv: (1, fc2),          bv: (1,)
    returns: (B, 1) float32  ==  v(relu(fc2(relu(fc1(state)))))
    """
    B, D = state.shape
    fc1 = w1.shape[0]
    fc2 = w2.shape[0]

    # Lane-multiple batch tile; shrink for small batches, pad batch up to a tile multiple.
    bt = min(batch_tile, pl.cdiv(B, 128) * 128)
    bt = max(128, (bt // 128) * 128)
    B_pad = pl.cdiv(B, bt) * bt
    num_tiles = B_pad // bt

    # Feature-major input slab (D, B_pad); padded columns are zeros and sliced off below.
    x_t = jnp.transpose(state).astype(jnp.float32)
    if B_pad != B:
        x_t = jnp.pad(x_t, ((0, 0), (0, B_pad - B)))

    # Biases / value weights as columns so they broadcast along the lane (batch) axis.
    b1c = b1.reshape(fc1, 1).astype(jnp.float32)
    b2c = b2.reshape(fc2, 1).astype(jnp.float32)
    wvc = wv.reshape(fc2, 1).astype(jnp.float32)
    bvc = bv.reshape(1, 1).astype(jnp.float32)

    flops = 2 * B_pad * (D * fc1 + fc1 * fc2 + fc2)
    bytes_accessed = 4 * (B_pad * D + B_pad + D * fc1 + fc1 + fc1 * fc2 + fc2 + fc2 + 1)

    out = pl.pallas_call(
        _critic_kernel,
        out_shape=jax.ShapeDtypeStruct((1, B_pad), jnp.float32),
        grid_spec=pltpu.PrefetchScalarGridSpec(
            num_scalar_prefetch=0,
            grid=(num_tiles,),
            in_specs=[
                pl.BlockSpec((D, bt), lambda i: (0, i)),      # x^T batch tile
                pl.BlockSpec((fc1, D), lambda i: (0, 0)),     # W1 (resident)
                pl.BlockSpec((fc1, 1), lambda i: (0, 0)),     # b1 column
                pl.BlockSpec((fc2, fc1), lambda i: (0, 0)),   # W2 (resident)
                pl.BlockSpec((fc2, 1), lambda i: (0, 0)),     # b2 column
                pl.BlockSpec((fc2, 1), lambda i: (0, 0)),     # v weight column
                pl.BlockSpec((1, 1), lambda i: (0, 0)),       # v bias
            ],
            out_specs=pl.BlockSpec((1, bt), lambda i: (0, i)),  # lane-dense value row
        ),
        compiler_params=pltpu.CompilerParams(
            dimension_semantics=("parallel",)),
        cost_estimate=pl.CostEstimate(
            flops=flops, transcendentals=0, bytes_accessed=bytes_accessed),
    )(x_t, w1.astype(jnp.float32), b1c, w2.astype(jnp.float32), b2c, wvc, bvc)

    return out[0, :B].reshape(B, 1)


def init_critic_params(key, input_dims, fc1_dims=256, fc2_dims=256):
    """PyTorch nn.Linear default init (uniform +/- 1/sqrt(fan_in)), PyTorch layout."""
    ks = jax.random.split(key, 6)

    def linear(kw, kb, fan_in, fan_out):
        bound = 1.0 / (float(fan_in) ** 0.5)
        w = jax.random.uniform(kw, (fan_out, fan_in), jnp.float32, -bound, bound)
        b = jax.random.uniform(kb, (fan_out,), jnp.float32, -bound, bound)
        return w, b

    w1, b1 = linear(ks[0], ks[1], input_dims, fc1_dims)
    w2, b2 = linear(ks[2], ks[3], fc1_dims, fc2_dims)
    wv, bv = linear(ks[4], ks[5], fc2_dims, 1)
    return w1, b1, w2, b2, wv, bv


def _reference_forward(state, w1, b1, w2, b2, wv, bv):
    h1 = jnp.maximum(state @ w1.T + b1, 0.0)
    h2 = jnp.maximum(h1 @ w2.T + b2, 0.0)
    return h2 @ wv.T + bv


if __name__ == "__main__":
    key = jax.random.PRNGKey(0)
    k_state, k_params = jax.random.split(key)

    batch = 16               # exercises the pad-to-tile path (tile shrinks to 128)
    input_dims = 32          # flattened joint observation
    fc1_dims = fc2_dims = 256

    state = jax.random.normal(k_state, (batch, input_dims), jnp.float32)
    params = init_critic_params(k_params, input_dims, fc1_dims, fc2_dims)

    v = critic_forward(state, *params)
    v = jax.block_until_ready(v)

    v_ref = _reference_forward(state, *params)
    assert v.shape == (batch, 1)
    assert jnp.allclose(v, v_ref, atol=1e-4, rtol=1e-4), "mismatch vs reference"

    print("KERNEL_OK")
</pallas_src>

<mosaic_0001>
module attributes {stable_mosaic.version = 11 : i64} {
  func.func @_critic_kernel(%arg0: i32, %arg1: memref<32x128xf32, #tpu.memory_space<vmem>>, %arg2: memref<256x32xf32, #tpu.memory_space<vmem>>, %arg3: memref<256x1xf32, #tpu.memory_space<vmem>>, %arg4: memref<256x256xf32, #tpu.memory_space<vmem>>, %arg5: memref<256x1xf32, #tpu.memory_space<vmem>>, %arg6: memref<256x1xf32, #tpu.memory_space<vmem>>, %arg7: memref<1x1xf32, #tpu.memory_space<vmem>>, %arg8: memref<1x128xf32, #tpu.memory_space<vmem>>) attributes {dimension_semantics = [#tpu.dimension_semantics<parallel>], iteration_bounds = array<i64: 1>, scalar_prefetch = 0 : i64, scratch_operands = 0 : i64, tpu.core_type = #tpu.core_type<tc>, window_params = [{transform_indices = @transform_0, window_bounds = array<i64: 32, 128>}, {pipeline_mode = #tpu.pipeline_mode<synchronous>, transform_indices = @transform_1, window_bounds = array<i64: 256, 32>}, {pipeline_mode = #tpu.pipeline_mode<synchronous>, transform_indices = @transform_2, window_bounds = array<i64: 256, 1>}, {pipeline_mode = #tpu.pipeline_mode<synchronous>, transform_indices = @transform_3, window_bounds = array<i64: 256, 256>}, {pipeline_mode = #tpu.pipeline_mode<synchronous>, transform_indices = @transform_4, window_bounds = array<i64: 256, 1>}, {pipeline_mode = #tpu.pipeline_mode<synchronous>, transform_indices = @transform_5, window_bounds = array<i64: 256, 1>}, {pipeline_mode = #tpu.pipeline_mode<synchronous>, transform_indices = @transform_6, window_bounds = array<i64: 1, 1>}, {transform_indices = @transform_7, window_bounds = array<i64: 1, 128>}]} {
    %c0 = arith.constant 0 : index
    %c0_0 = arith.constant 0 : index
    %0 = vector.load %arg1[%c0, %c0_0] : memref<32x128xf32, #tpu.memory_space<vmem>>, vector<32x128xf32>
    %c0_1 = arith.constant 0 : index
    %c0_2 = arith.constant 0 : index
    %1 = vector.load %arg2[%c0_1, %c0_2] : memref<256x32xf32, #tpu.memory_space<vmem>>, vector<256x32xf32>
    %cst = arith.constant dense<0.000000e+00> : vector<256x128xf32>
    %2 = tpu.matmul %1, %0, %cst {dimension_numbers = #tpu.dot_dimension_numbers<[1], [0], [0], [1], [0, 0, 1, 1], [], []>} : vector<256x32xf32>, vector<32x128xf32>, vector<256x128xf32> -> vector<256x128xf32>
    %c0_3 = arith.constant 0 : index
    %c0_4 = arith.constant 0 : index
    %3 = vector.load %arg3[%c0_3, %c0_4] : memref<256x1xf32, #tpu.memory_space<vmem>>, vector<256x1xf32>
    %4 = vector.broadcast %3 : vector<256x1xf32> to vector<256x128xf32>
    %5 = arith.addf %2, %4 : vector<256x128xf32>
    %cst_5 = arith.constant 0.000000e+00 : f32
    %6 = vector.broadcast %cst_5 : f32 to vector<256x128xf32>
    %7 = arith.maximumf %5, %6 : vector<256x128xf32>
    %c0_6 = arith.constant 0 : index
    %c0_7 = arith.constant 0 : index
    %8 = vector.load %arg4[%c0_6, %c0_7] : memref<256x256xf32, #tpu.memory_space<vmem>>, vector<256x256xf32>
    %cst_8 = arith.constant dense<0.000000e+00> : vector<256x128xf32>
    %9 = tpu.matmul %8, %7, %cst_8 {dimension_numbers = #tpu.dot_dimension_numbers<[1], [0], [0], [1], [0, 0, 1, 1], [], []>} : vector<256x256xf32>, vector<256x128xf32>, vector<256x128xf32> -> vector<256x128xf32>
    %c0_9 = arith.constant 0 : index
    %c0_10 = arith.constant 0 : index
    %10 = vector.load %arg5[%c0_9, %c0_10] : memref<256x1xf32, #tpu.memory_space<vmem>>, vector<256x1xf32>
    %11 = vector.broadcast %10 : vector<256x1xf32> to vector<256x128xf32>
    %12 = arith.addf %9, %11 : vector<256x128xf32>
    %cst_11 = arith.constant 0.000000e+00 : f32
    %13 = vector.broadcast %cst_11 : f32 to vector<256x128xf32>
    %14 = arith.maximumf %12, %13 : vector<256x128xf32>
    %c0_12 = arith.constant 0 : index
    %c0_13 = arith.constant 0 : index
    %15 = vector.load %arg6[%c0_12, %c0_13] : memref<256x1xf32, #tpu.memory_space<vmem>>, vector<256x1xf32>
    %16 = vector.broadcast %15 : vector<256x1xf32> to vector<256x128xf32>
    %17 = arith.mulf %14, %16 : vector<256x128xf32>
    %cst_14 = arith.constant dense<0.000000e+00> : vector<128xf32>
    %18 = vector.multi_reduction <add>, %17, %cst_14 [0] : vector<256x128xf32> to vector<128xf32>
    %19 = vector.shape_cast %18 : vector<128xf32> to vector<1x128xf32>
    %c0_15 = arith.constant 0 : index
    %c0_16 = arith.constant 0 : index
    %20 = vector.load %arg7[%c0_15, %c0_16] : memref<1x1xf32, #tpu.memory_space<vmem>>, vector<1x1xf32>
    %21 = vector.broadcast %20 : vector<1x1xf32> to vector<1x128xf32>
    %22 = arith.addf %19, %21 : vector<1x128xf32>
    %c0_17 = arith.constant 0 : index
    %c0_18 = arith.constant 0 : index
    %23 = vector.load %arg8[%c0_17, %c0_18] : memref<1x128xf32, #tpu.memory_space<vmem>>, vector<1x128xf32>
    tpu.vector_store %arg8[%c0_17, %c0_18], %22 {strides = array<i32>} : memref<1x128xf32, #tpu.memory_space<vmem>>, vector<1x128xf32>,
    return
  }
  func.func @transform_0(%arg0: i32) -> (i32, i32) {
    %c0_i32 = arith.constant 0 : i32
    %c0_i32_0 = arith.constant 0 : i32
    return %c0_i32, %arg0 : i32, i32
  }
  func.func @transform_1(%arg0: i32) -> (i32, i32) {
    %c0_i32 = arith.constant 0 : i32
    %c0_i32_0 = arith.constant 0 : i32
    %c0_i32_1 = arith.constant 0 : i32
    return %c0_i32, %c0_i32_0 : i32, i32
  }
  func.func @transform_2(%arg0: i32) -> (i32, i32) {
    %c0_i32 = arith.constant 0 : i32
    %c0_i32_0 = arith.constant 0 : i32
    %c0_i32_1 = arith.constant 0 : i32
    return %c0_i32, %c0_i32_0 : i32, i32
  }
  func.func @transform_3(%arg0: i32) -> (i32, i32) {
    %c0_i32 = arith.constant 0 : i32
    %c0_i32_0 = arith.constant 0 : i32
    %c0_i32_1 = arith.constant 0 : i32
    return %c0_i32, %c0_i32_0 : i32, i32
  }
  func.func @transform_4(%arg0: i32) -> (i32, i32) {
    %c0_i32 = arith.constant 0 : i32
    %c0_i32_0 = arith.constant 0 : i32
    %c0_i32_1 = arith.constant 0 : i32
    return %c0_i32, %c0_i32_0 : i32, i32
  }
  func.func @transform_5(%arg0: i32) -> (i32, i32) {
    %c0_i32 = arith.constant 0 : i32
    %c0_i32_0 = arith.constant 0 : i32
    %c0_i32_1 = arith.constant 0 : i32
    return %c0_i32, %c0_i32_0 : i32, i32
  }
  func.func @transform_6(%arg0: i32) -> (i32, i32) {
    %c0_i32 = arith.constant 0 : i32
    %c0_i32_0 = arith.constant 0 : i32
    %c0_i32_1 = arith.constant 0 : i32
    return %c0_i32, %c0_i32_0 : i32, i32
  }
  func.func @transform_7(%arg0: i32) -> (i32, i32) {
    %c0_i32 = arith.constant 0 : i32
    %c0_i32_0 = arith.constant 0 : i32
    return %c0_i32, %arg0 : i32, i32
  }
}

</mosaic_0001>

<bundles_post_ra>
// kernel: critic_forward.1
= control target key start
LH: loop header
LB: loop body
LE: loop exit
PB: predicated region body
PF: predicated region fallthrough
CT: control target
= control target key end

     0   :  { %v1616_v0 = vmov 0   ;;  %vm256_vm0 = vcmask 261120   ;;  %s2472_s2 = inlined_call_operand.vmem [shape: f32[256,1], index: 2, kind: input, shape index: {}]   ;;  %s2473_s0 = inlined_call_operand.vmem [shape: f32[32,128], index: 0, kind: input, shape index: {}]   ;;  %s2474_s1 = inlined_call_operand.vmem [shape: f32[256,32], index: 1, kind: input, shape index: {}]   ;;  %s2475_s6 = inlined_call_operand.<no memory space> [shape: f32[1,1], index: 6, kind: input, shape index: {}]   ;;  %s2476_s4 = inlined_call_operand.vmem [shape: f32[256,1], index: 4, kind: input, shape index: {}]   ;;  %s2477_s5 = inlined_call_operand.vmem [shape: f32[256,1], index: 5, kind: input, shape index: {}]   ;;  %s2478_s3 = inlined_call_operand.vmem [shape: f32[256,256], index: 3, kind: input, shape index: {}]   ;;  %s2479_s7 = inlined_call_operand.vmem [shape: f32[1,128], index: 7, kind: output, shape index: {}]  }
   0x1   :  { %1615 = vset.pattern.permute.xlu1 %v1616_v0  ;;  %1614 = vset.pattern.permute.xlu0 %v1616_v0  ;;  %v66_v1 = vld [vmem:[%s2472_s2 + $0x10] sm:$0xff]  ;;  %v64_v2 = vld [vmem:[%s2472_s2] sm:$0xff]  ;;  %v29_v4 = vld [vmem:[%s2473_s0 + $0x8] sm:$0xff]  ;;  %v12_v63 = vstv %s2475_s6 }
   0x2   :  { %v28_v3 = vld [vmem:[%s2473_s0] sm:$0xff]  ;;  %108 = vperm.xlu1 %1615, %v66_v1   ;;  %98 = vperm.xlu0 %1614, %v64_v2   ;;  %v67_v6 = vld [vmem:[%s2472_s2 + $0x18] sm:$0xff]  ;;  %v30_v7 = vld [vmem:[%s2473_s0 + $0x10] sm:$0xff]  ;;  %13 = vst [vmem:[#allocation2] sm:$0x1] %v12_v63 }
   0x3   :  { %v1524_v5 = vpack.c.bf16 %v29_v4, %v28_v3  ;;  %v31_v8 = vld [vmem:[%s2473_s0 + $0x18] sm:$0xff]  ;;  %v65_v9 = vld [vmem:[%s2472_s2 + $0x8] sm:$0xff]  ;;  %v32_v11 = vld [vmem:[%s2474_s1] sm:$0xff] }
   0x4   :  { %v1528_v10 = vpack.c.bf16 %v31_v8, %v30_v7  ;;  %1476 = vmatprep.mubr.msk.f32.mxu0 %vm256_vm0, %v32_v11  ;;  %v69_v12 = vld [vmem:[%s2472_s2 + $0x28] sm:$0xff]  ;;  %v68_v13 = vld [vmem:[%s2472_s2 + $0x20] sm:$0xff]  ;;  %v71_v15 = vld [vmem:[%s2472_s2 + $0x38] sm:$0xff] }
   0x5   :  { %1525 = vmatprep.subr.bf16.mxu0 %v1524_v5  ;;  %v33_v14 = vld [vmem:[%s2474_s1 + $0x8] sm:$0xff]  ;;  %v34_v16 = vld [vmem:[%s2474_s1 + $0x10] sm:$0xff]  ;;  %v35_v18 = vld [vmem:[%s2474_s1 + $0x18] sm:$0xff] }
   0x6   :  { %1527 = vmatpush3.bf16.msra.mxu0 %v1524_v5  ;;  %113 = vperm.xlu1 %1615, %v67_v6   ;;  %v70_v17 = vld [vmem:[%s2472_s2 + $0x30] sm:$0xff]  ;;  %v73_v19 = vld [vmem:[%s2472_s2 + $0x48] sm:$0xff]  ;;  %v36_v20 = vld [vmem:[%s2474_s1 + $0x20] sm:$0xff] }
   0x7   :  { %103 = vperm.xlu0 %1614, %v65_v9   ;;  %1529 = vmatprep.subr.bf16.mxu0 %v1528_v10  ;;  %v72_v21 = vld [vmem:[%s2472_s2 + $0x40] sm:$0xff]  ;;  %v37_v22 = vld [vmem:[%s2474_s1 + $0x28] sm:$0xff]  ;;  %v75_v23 = vld [vmem:[%s2472_s2 + $0x58] sm:$0xff] }
   0x8   :  { %v38_v24 = vld [vmem:[%s2474_s1 + $0x30] sm:$0xff]  ;;  %v39_v26 = vld [vmem:[%s2474_s1 + $0x38] sm:$0xff]  ;;  %v77_v27 = vld [vmem:[%s2472_s2 + $0x68] sm:$0xff] }
   0x9   :  { %v74_v25 = vld [vmem:[%s2472_s2 + $0x50] sm:$0xff]  ;;  %v40_v28 = vld [vmem:[%s2474_s1 + $0x40] sm:$0xff]  ;;  %v41_v30 = vld [vmem:[%s2474_s1 + $0x48] sm:$0xff] }
   0xa   :  { %1531 = vmatpush3.bf16.msra.mxu0 %v1528_v10  ;;  %123 = vperm.xlu1 %1615, %v69_v12   ;;  %v76_v29 = vld [vmem:[%s2472_s2 + $0x60] sm:$0xff]  ;;  %v79_v31 = vld [vmem:[%s2472_s2 + $0x78] sm:$0xff]  ;;  %v42_v32 = vld [vmem:[%s2474_s1 + $0x50] sm:$0xff] }
   0xb   :  { %118 = vperm.xlu0 %1614, %v68_v13   ;;  %v78_v33 = vld [vmem:[%s2472_s2 + $0x70] sm:$0xff]  ;;  %v43_v34 = vld [vmem:[%s2474_s1 + $0x58] sm:$0xff]  ;;  %v81_v35 = vld [vmem:[%s2472_s2 + $0x88] sm:$0xff] }
   0xc   :  { %v44_v36 = vld [vmem:[%s2474_s1 + $0x60] sm:$0xff]  ;;  %v45_v38 = vld [vmem:[%s2474_s1 + $0x68] sm:$0xff]  ;;  %v83_v39 = vld [vmem:[%s2472_s2 + $0x98] sm:$0xff] }
   0xd   :  { %1477 = vmatmul.mubr.msk.f32.vlgmr.msra.gmra.mrb[0].mxu0 %vm256_vm0, %v33_v14  ;;  %v80_v37 = vld [vmem:[%s2472_s2 + $0x80] sm:$0xff]  ;;  %v46_v40 = vld [vmem:[%s2474_s1 + $0x70] sm:$0xff]  ;;  %v47_v42 = vld [vmem:[%s2474_s1 + $0x78] sm:$0xff] }
   0xe   :  { %133 = vperm.xlu1 %1615, %v71_v15   ;;  %1479 = vmatprep.mubr.msk.f32.mxu0 %vm256_vm0, %v34_v16  ;;  %v82_v41 = vld [vmem:[%s2472_s2 + $0x90] sm:$0xff]  ;;  %v85_v43 = vld [vmem:[%s2472_s2 + $0xa8] sm:$0xff]  ;;  %v48_v44 = vld [vmem:[%s2474_s1 + $0x80] sm:$0xff] }
   0xf   :  { %128 = vperm.xlu0 %1614, %v70_v17   ;;  %v84_v45 = vld [vmem:[%s2472_s2 + $0xa0] sm:$0xff]  ;;  %v49_v46 = vld [vmem:[%s2474_s1 + $0x88] sm:$0xff]  ;;  %v87_v47 = vld [vmem:[%s2472_s2 + $0xb8] sm:$0xff] }
  0x10   :  { %v50_v48 = vld [vmem:[%s2474_s1 + $0x90] sm:$0xff]  ;;  %v51_v50 = vld [vmem:[%s2474_s1 + $0x98] sm:$0xff]  ;;  %v89_v51 = vld [vmem:[%s2472_s2 + $0xc8] sm:$0xff] }
  0x11   :  { %1480 = vmatmul.mubr.msk.f32.gmra.mrb[2].mxu0 %vm256_vm0, %v35_v18  ;;  %v86_v49 = vld [vmem:[%s2472_s2 + $0xb0] sm:$0xff]  ;;  %v52_v52 = vld [vmem:[%s2474_s1 + $0xa0] sm:$0xff]  ;;  %v53_v54 = vld [vmem:[%s2474_s1 + $0xa8] sm:$0xff] }
  0x12   :  { %143 = vperm.xlu1 %1615, %v73_v19   ;;  %1482 = vmatprep.mubr.msk.f32.mxu0 %vm256_vm0, %v36_v20  ;;  %v88_v53 = vld [vmem:[%s2472_s2 + $0xc0] sm:$0xff]  ;;  %v91_v55 = vld [vmem:[%s2472_s2 + $0xd8] sm:$0xff]  ;;  %v54_v56 = vld [vmem:[%s2474_s1 + $0xb0] sm:$0xff] }
  0x13   :  { %138 = vperm.xlu0 %1614, %v72_v21   ;;  %v90_v57 = vld [vmem:[%s2472_s2 + $0xd0] sm:$0xff]  ;;  %v55_v58 = vld [vmem:[%s2474_s1 + $0xb8] sm:$0xff]  ;;  %v93_v59 = vld [vmem:[%s2472_s2 + $0xe8] sm:$0xff] }
  0x14   :  { %v56_v60 = vld [vmem:[%s2474_s1 + $0xc0] sm:$0xff]  ;;  %v57_v62 = vld [vmem:[%s2474_s1 + $0xc8] sm:$0xff]  ;;  %v95_v0 = vld [vmem:[%s2472_s2 + $0xf8] sm:$0xff] }
  0x15   :  { %1483 = vmatmul.mubr.msk.f32.gmra.mrb[4].mxu0 %vm256_vm0, %v37_v22  ;;  %v92_v61 = vld [vmem:[%s2472_s2 + $0xe0] sm:$0xff]  ;;  %v58_v1 = vld [vmem:[%s2474_s1 + $0xd0] sm:$0xff]  ;;  %v59_v3 = vld [vmem:[%s2474_s1 + $0xd8] sm:$0xff] }
  0x16   :  { %153 = vperm.xlu1 %1615, %v75_v23   ;;  %1485 = vmatprep.mubr.msk.f32.mxu0 %vm256_vm0, %v38_v24  ;;  %v94_v2 = vld [vmem:[%s2472_s2 + $0xf0] sm:$0xff]  ;;  %v675_v4 = vld [vmem:[%s2476_s4 + $0x8] sm:$0xff]  ;;  %v60_v5 = vld [vmem:[%s2474_s1 + $0xe0] sm:$0xff] }
  0x17   :  { %148 = vperm.xlu0 %1614, %v74_v25   ;;  %v674_v6 = vld [vmem:[%s2476_s4] sm:$0xff]  ;;  %v61_v7 = vld [vmem:[%s2474_s1 + $0xe8] sm:$0xff]  ;;  %v677_v8 = vld [vmem:[%s2476_s4 + $0x18] sm:$0xff] }
  0x18   :  { %v62_v9 = vld [vmem:[%s2474_s1 + $0xf0] sm:$0xff]  ;;  %v63_v11 = vld [vmem:[%s2474_s1 + $0xf8] sm:$0xff]  ;;  %v679_v12 = vld [vmem:[%s2476_s4 + $0x28] sm:$0xff] }
  0x19   :  { %1486 = vmatmul.mubr.msk.f32.gmra.mrb[6].mxu0 %vm256_vm0, %v39_v26  ;;  %v676_v10 = vld [vmem:[%s2476_s4 + $0x10] sm:$0xff]  ;;  %v678_v13 = vld [vmem:[%s2476_s4 + $0x20] sm:$0xff]  ;;  %v681_v14 = vld [vmem:[%s2476_s4 + $0x38] sm:$0xff] }
  0x1a   :  { %163 = vperm.xlu1 %1615, %v77_v27   ;;  %1488 = vmatprep.mubr.msk.f32.mxu0 %vm256_vm0, %v40_v28  ;;  %v680_v15 = vld [vmem:[%s2476_s4 + $0x30] sm:$0xff]  ;;  %v683_v16 = vld [vmem:[%s2476_s4 + $0x48] sm:$0xff]  ;;  %v682_v17 = vld [vmem:[%s2476_s4 + $0x40] sm:$0xff] }
  0x1b   :  { %158 = vperm.xlu0 %1614, %v76_v29   ;;  %v685_v18 = vld [vmem:[%s2476_s4 + $0x58] sm:$0xff]  ;;  %v684_v19 = vld [vmem:[%s2476_s4 + $0x50] sm:$0xff]  ;;  %v687_v20 = vld [vmem:[%s2476_s4 + $0x68] sm:$0xff]  ;;  %v1617_v29 = vmov 0.0|0.0  }
  0x1c   :  { %v686_v21 = vld [vmem:[%s2476_s4 + $0x60] sm:$0xff]  ;;  %v689_v22 = vld [vmem:[%s2476_s4 + $0x78] sm:$0xff]  ;;  %v688_v23 = vld [vmem:[%s2476_s4 + $0x70] sm:$0xff]  ;;  %1532 = vmatprep.subr.bf16.mxu0 %v1617_v29  ;;  %1580 = vmatprep.subr.bf16.mxu1 %v1617_v29 }
  0x1d   :  { %1489 = vmatmul.mubr.msk.f32.gmra.mrb[8].mxu0 %vm256_vm0, %v41_v30  ;;  %v691_v24 = vld [vmem:[%s2476_s4 + $0x88] sm:$0xff]  ;;  %v690_v25 = vld [vmem:[%s2476_s4 + $0x80] sm:$0xff]  ;;  %v693_v26 = vld [vmem:[%s2476_s4 + $0x98] sm:$0xff] }
  0x1e   :  { %173 = vperm.xlu1 %1615, %v79_v31   ;;  %1491 = vmatprep.mubr.msk.f32.mxu0 %vm256_vm0, %v42_v32  ;;  %v692_v27 = vld [vmem:[%s2476_s4 + $0x90] sm:$0xff]  ;;  %v695_v28 = vld [vmem:[%s2476_s4 + $0xa8] sm:$0xff]  ;;  %v694_v30 = vld [vmem:[%s2476_s4 + $0xa0] sm:$0xff] }
  0x1f   :  { %168 = vperm.xlu0 %1614, %v78_v33   ;;  %v697_v31 = vld [vmem:[%s2476_s4 + $0xb8] sm:$0xff]  ;;  %v696_v32 = vld [vmem:[%s2476_s4 + $0xb0] sm:$0xff]  ;;  %v699_v33 = vld [vmem:[%s2476_s4 + $0xc8] sm:$0xff] }
  0x20   :  { %v1146_v63 = vld [vmem:[%s2477_s5 + $0xb8] sm:$0xff] }
  0x21   :  { %1492 = vmatmul.mubr.msk.f32.gmra.mrb[10].mxu0 %vm256_vm0, %v43_v34  ;;  %v698_v34 = vld [vmem:[%s2476_s4 + $0xc0] sm:$0xff] }
  0x22   :  { %183 = vperm.xlu1 %1615, %v81_v35   ;;  %1494 = vmatprep.mubr.msk.f32.mxu0 %vm256_vm0, %v44_v36  ;;  %v701_v35 = vld [vmem:[%s2476_s4 + $0xd8] sm:$0xff]  ;;  %v700_v36 = vld [vmem:[%s2476_s4 + $0xd0] sm:$0xff] }
  0x23   :  { %178 = vperm.xlu0 %1614, %v80_v37   ;;  %v703_v37 = vld [vmem:[%s2476_s4 + $0xe8] sm:$0xff] }
  0x25   :  { %1495 = vmatmul.mubr.msk.f32.gmra.mrb[12].mxu0 %vm256_vm0, %v45_v38  ;;  %v702_v38 = vld [vmem:[%s2476_s4 + $0xe0] sm:$0xff] }
  0x26   :  { %193 = vperm.xlu1 %1615, %v83_v39   ;;  %1497 = vmatprep.mubr.msk.f32.mxu0 %vm256_vm0, %v46_v40  ;;  %v1124_v39 = vld [vmem:[%s2477_s5 + $0x8] sm:$0xff]  ;;  %v1123_v40 = vld [vmem:[%s2477_s5] sm:$0xff] }
  0x27   :  { %188 = vperm.xlu0 %1614, %v82_v41   ;;  %v1126_v41 = vld [vmem:[%s2477_s5 + $0x18] sm:$0xff] }
  0x29   :  { %1498 = vmatmul.mubr.msk.f32.gmra.mrb[14].mxu0 %vm256_vm0, %v47_v42  ;;  %v1125_v42 = vld [vmem:[%s2477_s5 + $0x10] sm:$0xff] }
  0x2a   :  { %203 = vperm.xlu1 %1615, %v85_v43   ;;  %1500 = vmatprep.mubr.msk.f32.mxu0 %vm256_vm0, %v48_v44  ;;  %v1128_v43 = vld [vmem:[%s2477_s5 + $0x28] sm:$0xff]  ;;  %v1127_v44 = vld [vmem:[%s2477_s5 + $0x20] sm:$0xff] }
  0x2b   :  { %198 = vperm.xlu0 %1614, %v84_v45   ;;  %v1130_v45 = vld [vmem:[%s2477_s5 + $0x38] sm:$0xff] }
  0x2d   :  { %1501 = vmatmul.mubr.msk.f32.gmra.mrb[16].mxu0 %vm256_vm0, %v49_v46  ;;  %v1129_v46 = vld [vmem:[%s2477_s5 + $0x30] sm:$0xff] }
  0x2e   :  { %213 = vperm.xlu1 %1615, %v87_v47   ;;  %1503 = vmatprep.mubr.msk.f32.mxu0 %vm256_vm0, %v50_v48  ;;  %v1132_v47 = vld [vmem:[%s2477_s5 + $0x48] sm:$0xff]  ;;  %v1131_v48 = vld [vmem:[%s2477_s5 + $0x40] sm:$0xff] }
  0x2f   :  { %208 = vperm.xlu0 %1614, %v86_v49   ;;  %v1134_v49 = vld [vmem:[%s2477_s5 + $0x58] sm:$0xff] }
  0x31   :  { %1504 = vmatmul.mubr.msk.f32.gmra.mrb[18].mxu0 %vm256_vm0, %v51_v50  ;;  %v1133_v50 = vld [vmem:[%s2477_s5 + $0x50] sm:$0xff] }
  0x32   :  { %223 = vperm.xlu1 %1615, %v89_v51   ;;  %1506 = vmatprep.mubr.msk.f32.mxu0 %vm256_vm0, %v52_v52  ;;  %v1136_v51 = vld [vmem:[%s2477_s5 + $0x68] sm:$0xff]  ;;  %v1135_v52 = vld [vmem:[%s2477_s5 + $0x60] sm:$0xff] }
  0x33   :  { %218 = vperm.xlu0 %1614, %v88_v53   ;;  %v1138_v53 = vld [vmem:[%s2477_s5 + $0x78] sm:$0xff] }
  0x35   :  { %1507 = vmatmul.mubr.msk.f32.gmra.mrb[20].mxu0 %vm256_vm0, %v53_v54  ;;  %v1137_v54 = vld [vmem:[%s2477_s5 + $0x70] sm:$0xff] }
  0x36   :  { %233 = vperm.xlu1 %1615, %v91_v55   ;;  %1509 = vmatprep.mubr.msk.f32.mxu0 %vm256_vm0, %v54_v56  ;;  %v1140_v55 = vld [vmem:[%s2477_s5 + $0x88] sm:$0xff]  ;;  %v1139_v56 = vld [vmem:[%s2477_s5 + $0x80] sm:$0xff] }
  0x37   :  { %228 = vperm.xlu0 %1614, %v90_v57   ;;  %v1142_v57 = vld [vmem:[%s2477_s5 + $0x98] sm:$0xff] }
  0x39   :  { %1510 = vmatmul.mubr.msk.f32.gmra.mrb[22].mxu0 %vm256_vm0, %v55_v58  ;;  %v1141_v58 = vld [vmem:[%s2477_s5 + $0x90] sm:$0xff] }
  0x3a   :  { %243 = vperm.xlu1 %1615, %v93_v59   ;;  %1512 = vmatprep.mubr.msk.f32.mxu0 %vm256_vm0, %v56_v60  ;;  %v1144_v59 = vld [vmem:[%s2477_s5 + $0xa8] sm:$0xff]  ;;  %v1143_v60 = vld [vmem:[%s2477_s5 + $0xa0] sm:$0xff] }
  0x3b   :  { %238 = vperm.xlu0 %1614, %v92_v61   ;;  %v641_v61 = vld [vmem:[%s2478_s3 + $0xf8] sm:$0xff] }
  0x3c   :  { %1005 = vmatprep.mubr.f32.mxu1 %v641_v61 }
  0x3d   :  { %1513 = vmatmul.mubr.msk.f32.gmra.mrb[24].mxu0 %vm256_vm0, %v57_v62  ;;  %v611_v62 = vld [vmem:[%s2478_s3 + $0x8] sm:$0xff] }
  0x3e   :  { %253 = vperm.xlu1 %1615, %v95_v0   ;;  %1515 = vmatprep.mubr.msk.f32.mxu0 %vm256_vm0, %v58_v1  ;;  %v1145_v0 = vld [vmem:[%s2477_s5 + $0xb0] sm:$0xff]  ;;  %v1148_v1 = vld [vmem:[%s2477_s5 + $0xc8] sm:$0xff] }
  0x3f   :  { %248 = vperm.xlu0 %1614, %v94_v2   ;;  %v1147_v2 = vld [vmem:[%s2477_s5 + $0xc0] sm:$0xff] }
  0x41   :  { %1516 = vmatmul.mubr.msk.f32.gmra.mrb[26].mxu0 %vm256_vm0, %v59_v3  ;;  %v1150_v3 = vld [vmem:[%s2477_s5 + $0xd8] sm:$0xff] }
  0x42   :  { %713 = vperm.xlu1 %1615, %v675_v4   ;;  %1518 = vmatprep.mubr.msk.f32.mxu0 %vm256_vm0, %v60_v5  ;;  %v1149_v4 = vld [vmem:[%s2477_s5 + $0xd0] sm:$0xff]  ;;  %v1151_v5 = vld [vmem:[%s2477_s5 + $0xe0] sm:$0xff] }
  0x43   :  { %708 = vperm.xlu0 %1614, %v674_v6   ;;  %v704_v6 = vld [vmem:[%s2476_s4 + $0xf0] sm:$0xff] }
  0x45   :  { %1519 = vmatmul.mubr.msk.f32.gmra.mrb[28].mxu0 %vm256_vm0, %v61_v7  ;;  %v1152_v7 = vld [vmem:[%s2477_s5 + $0xe8] sm:$0xff] }
  0x46   :  { %723 = vperm.xlu1 %1615, %v677_v8   ;;  %1521 = vmatprep.mubr.msk.f32.mxu0 %vm256_vm0, %v62_v9  ;;  %v705_v8 = vld [vmem:[%s2476_s4 + $0xf8] sm:$0xff] }
  0x47   :  { %718 = vperm.xlu0 %1614, %v676_v10   ;;  %v1154_v9 = vld [vmem:[%s2477_s5 + $0xf8] sm:$0xff]  ;;  %v1153_v10 = vld [vmem:[%s2477_s5 + $0xf0] sm:$0xff] }
  0x49   :  { %1522 = vmatmul.mubr.msk.f32.gmra.mrb[30].mxu0 %vm256_vm0, %v63_v11  ;;  %v1384_v11 = vld [vmem:[#allocation2] sm:$0x1] }
  0x4a   :  { %733 = vperm.xlu1 %1615, %v679_v12   ;;  %930 = vmatprep.mubr.f32.mxu0 %v611_v62 }
  0x4b   :  { %728 = vperm.xlu0 %1614, %v678_v13  }
  0x4e   :  { %743 = vperm.xlu1 %1615, %v681_v14  }
  0x4f   :  { %738 = vperm.xlu0 %1614, %v680_v15  }
  0x52   :  { %753 = vperm.xlu1 %1615, %v683_v16  }
  0x53   :  { %748 = vperm.xlu0 %1614, %v682_v17  }
  0x56   :  { %763 = vperm.xlu1 %1615, %v685_v18  }
  0x57   :  { %758 = vperm.xlu0 %1614, %v684_v19  }
  0x5a   :  { %773 = vperm.xlu1 %1615, %v687_v20  }
  0x5b   :  { %768 = vperm.xlu0 %1614, %v686_v21  }
  0x5e   :  { %783 = vperm.xlu1 %1615, %v689_v22  }
  0x5f   :  { %778 = vperm.xlu0 %1614, %v688_v23  }
  0x62   :  { %793 = vperm.xlu1 %1615, %v691_v24  }
  0x63   :  { %788 = vperm.xlu0 %1614, %v690_v25  }
  0x66   :  { %803 = vperm.xlu1 %1615, %v693_v26  }
  0x67   :  { %798 = vperm.xlu0 %1614, %v692_v27  }
  0x6a   :  { %813 = vperm.xlu1 %1615, %v695_v28  }
  0x6b   :  { %808 = vperm.xlu0 %1614, %v694_v30  }
  0x6e   :  { %823 = vperm.xlu1 %1615, %v697_v31  }
  0x6f   :  { %818 = vperm.xlu0 %1614, %v696_v32  }
  0x72   :  { %833 = vperm.xlu1 %1615, %v699_v33  }
  0x73   :  { %828 = vperm.xlu0 %1614, %v698_v34  }
  0x76   :  { %843 = vperm.xlu1 %1615, %v701_v35  }
  0x77   :  { %838 = vperm.xlu0 %1614, %v700_v36  }
  0x7a   :  { %853 = vperm.xlu1 %1615, %v703_v37  }
  0x7b   :  { %848 = vperm.xlu0 %1614, %v702_v38  }
  0x7e   :  { %1162 = vperm.xlu1 %1615, %v1124_v39  }
  0x7f   :  { %1157 = vperm.xlu0 %1614, %v1123_v40  }
  0x81   :  { %v109_v12 = vpop.permute.xlu1 %108  ;;  %v99_v13 = vpop.permute.xlu0 %98 }
  0x82   :  { %1172 = vperm.xlu1 %1615, %v1126_v41  }
  0x83   :  { %1167 = vperm.xlu0 %1614, %v1125_v42  }
  0x85   :  { %v114_v14 = vpop.permute.xlu1 %113 }
  0x86   :  { %1182 = vperm.xlu1 %1615, %v1128_v43   ;;  %v104_v15 = vpop.permute.xlu0 %103 }
  0x87   :  { %1177 = vperm.xlu0 %1614, %v1127_v44  }
  0x89   :  { %v124_v16 = vpop.permute.xlu1 %123 }
  0x8a   :  { %1192 = vperm.xlu1 %1615, %v1130_v45   ;;  %v119_v17 = vpop.permute.xlu0 %118 }
  0x8b   :  { %1187 = vperm.xlu0 %1614, %v1129_v46  }
  0x8d   :  { %v134_v18 = vpop.permute.xlu1 %133 }
  0x8e   :  { %1202 = vperm.xlu1 %1615, %v1132_v47   ;;  %v129_v19 = vpop.permute.xlu0 %128 }
  0x8f   :  { %1197 = vperm.xlu0 %1614, %v1131_v48  }
  0x91   :  { %v144_v20 = vpop.permute.xlu1 %143 }
  0x92   :  { %1212 = vperm.xlu1 %1615, %v1134_v49   ;;  %v139_v21 = vpop.permute.xlu0 %138 }
  0x93   :  { %1207 = vperm.xlu0 %1614, %v1133_v50  }
  0x95   :  { %v154_v22 = vpop.permute.xlu1 %153 }
  0x96   :  { %1222 = vperm.xlu1 %1615, %v1136_v51   ;;  %v149_v24 = vpop.permute.xlu0 %148 }
  0x97   :  { %1217 = vperm.xlu0 %1614, %v1135_v52  }
  0x99   :  { %v164_v34 = vpop.permute.xlu1 %163 }
  0x9a   :  { %1232 = vperm.xlu1 %1615, %v1138_v53   ;;  %v159_v37 = vpop.permute.xlu0 %158 }
  0x9b   :  { %1227 = vperm.xlu0 %1614, %v1137_v54  }
  0x9d   :  { %v174_v46 = vpop.permute.xlu1 %173 }
  0x9e   :  { %1242 = vperm.xlu1 %1615, %v1140_v55   ;;  %v169_v49 = vpop.permute.xlu0 %168 }
  0x9f   :  { %1237 = vperm.xlu0 %1614, %v1139_v56  }
  0xa2   :  { %1252 = vperm.xlu1 %1615, %v1142_v57   ;;  %v179_v62 = vpop.permute.xlu0 %178 }
  0xa3   :  { %1247 = vperm.xlu0 %1614, %v1141_v58  }
  0xa6   :  { %1262 = vperm.xlu1 %1615, %v1144_v59   ;;  %v184_v59 = vpop.permute.xlu1 %183 }
  0xa7   :  { %1257 = vperm.xlu0 %1614, %v1143_v60  }
  0xaa   :  { %1272 = vperm.xlu1 %1615, %v1146_v63  }
  0xab   :  { %1267 = vperm.xlu0 %1614, %v1145_v0  }
  0xae   :  { %1282 = vperm.xlu1 %1615, %v1148_v1  }
  0xaf   :  { %1277 = vperm.xlu0 %1614, %v1147_v2  }
  0xb2   :  { %1292 = vperm.xlu1 %1615, %v1150_v3  }
  0xb3   :  { %1287 = vperm.xlu0 %1614, %v1149_v4  }
  0xb6   :  { %1297 = vperm.xlu1 %1615, %v1151_v5  }
  0xb7   :  { %858 = vperm.xlu0 %1614, %v704_v6  }
  0xba   :  { %1302 = vperm.xlu1 %1615, %v1152_v7   ;;  %v194_v7 = vpop.permute.xlu1 %193 }
  0xbb   :  { %863 = vperm.xlu0 %1614, %v705_v8  }
  0xbe   :  { %1312 = vperm.xlu1 %1615, %v1154_v9  }
  0xbf   :  { %1307 = vperm.xlu0 %1614, %v1153_v10   ;;  %v189_v10 = vpop.permute.xlu0 %188 }
  0xc3   :  { %1387 = vperm.xlu0 %1614, %v1384_v11  }
  0xe0   :  { %v1478_v23 = vpop.f32.mrb[0].mxu0 }
  0xe1   :  { %v425_v25 = vadd.f32 %v1478_v23, %v104_v15  ;;  %v419_v26 = vpop.f32.mrb[1].mxu0  ;;  %v199_v23 = vpop.permute.xlu0 %198 }
  0xe2   :  { %v420_v27 = vadd.f32 %v419_v26, %v99_v13 }
  0xe3   :  { %v579_v28 = vmax.f32 %v425_v25, 0.0 }
  0xe4   :  { %v578_v30 = vmax.f32 %v420_v27, 0.0  ;;  %v1481_v31 = vpop.f32.mrb[2].mxu0 }
  0xe5   :  { %v435_v32 = vadd.f32 %v1481_v31, %v114_v14  ;;  %v429_v33 = vpop.f32.mrb[3].mxu0 }
  0xe6   :  { %v1533_v35 = vpack.c.bf16 %v579_v28, %v578_v30  ;;  %v430_v36 = vadd.f32 %v429_v33, %v109_v12 }
  0xe7   :  { %v581_v38 = vmax.f32 %v435_v32, 0.0 }
  0xe8   :  { %v580_v39 = vmax.f32 %v430_v36, 0.0  ;;  %v1484_v40 = vpop.f32.mrb[4].mxu0  ;;  %1534 = vmatpush1.bf16.msra.mxu0 %v1533_v35  ;;  %1596 = vmatpush1.bf16.msra.mxu1 %v1533_v35  ;;  %v209_v36 = vpop.permute.xlu0 %208 }
  0xe9   :  { %v445_v41 = vadd.f32 %v1484_v40, %v124_v16  ;;  %v439_v42 = vpop.f32.mrb[5].mxu0  ;;  %1535 = vmatprep.subr.bf16.mxu0 %v1617_v29  ;;  %1581 = vmatprep.subr.bf16.mxu1 %v1617_v29 }
  0xea   :  { %v1536_v43 = vpack.c.bf16 %v581_v38, %v580_v39  ;;  %v440_v44 = vadd.f32 %v439_v42, %v119_v17 }
  0xeb   :  { %v583_v45 = vmax.f32 %v445_v41, 0.0 }
  0xec   :  { %v582_v47 = vmax.f32 %v440_v44, 0.0  ;;  %v1487_v48 = vpop.f32.mrb[6].mxu0  ;;  %1537 = vmatpush1.bf16.msra.mxu0 %v1536_v43  ;;  %1597 = vmatpush1.bf16.msra.mxu1 %v1536_v43 }
  0xed   :  { %v455_v50 = vadd.f32 %v1487_v48, %v134_v18  ;;  %v449_v51 = vpop.f32.mrb[7].mxu0  ;;  %1538 = vmatprep.subr.bf16.mxu0 %v1617_v29  ;;  %1582 = vmatprep.subr.bf16.mxu1 %v1617_v29 }
  0xee   :  { %v1539_v52 = vpack.c.bf16 %v583_v45, %v582_v47  ;;  %v450_v53 = vadd.f32 %v449_v51, %v129_v19 }
  0xef   :  { %v585_v54 = vmax.f32 %v455_v50, 0.0 }
  0xf0   :  { %v584_v55 = vmax.f32 %v450_v53, 0.0  ;;  %v1490_v56 = vpop.f32.mrb[8].mxu0  ;;  %1540 = vmatpush1.bf16.msra.mxu0 %v1539_v52  ;;  %1598 = vmatpush1.bf16.msra.mxu1 %v1539_v52 }
  0xf1   :  { %v465_v57 = vadd.f32 %v1490_v56, %v144_v20  ;;  %v459_v58 = vpop.f32.mrb[9].mxu0  ;;  %1541 = vmatprep.subr.bf16.mxu0 %v1617_v29  ;;  %1583 = vmatprep.subr.bf16.mxu1 %v1617_v29  ;;  %v204_v20 = vpop.permute.xlu1 %203 }
  0xf2   :  { %v1542_v60 = vpack.c.bf16 %v585_v54, %v584_v55  ;;  %v460_v61 = vadd.f32 %v459_v58, %v139_v21 }
  0xf3   :  { %v587_v63 = vmax.f32 %v465_v57, 0.0 }
  0xf4   :  { %v586_v0 = vmax.f32 %v460_v61, 0.0  ;;  %v1493_v1 = vpop.f32.mrb[10].mxu0  ;;  %1543 = vmatpush1.bf16.msra.mxu0 %v1542_v60  ;;  %1599 = vmatpush1.bf16.msra.mxu1 %v1542_v60 }
  0xf5   :  { %v475_v2 = vadd.f32 %v1493_v1, %v154_v22  ;;  %v469_v3 = vpop.f32.mrb[11].mxu0  ;;  %1544 = vmatprep.subr.bf16.mxu0 %v1617_v29  ;;  %1584 = vmatprep.subr.bf16.mxu1 %v1617_v29  ;;  %v214_v33 = vpop.permute.xlu1 %213 }
  0xf6   :  { %v1545_v4 = vpack.c.bf16 %v587_v63, %v586_v0  ;;  %v470_v5 = vadd.f32 %v469_v3, %v149_v24 }
  0xf7   :  { %v589_v6 = vmax.f32 %v475_v2, 0.0 }
  0xf8   :  { %v588_v8 = vmax.f32 %v470_v5, 0.0  ;;  %v1496_v9 = vpop.f32.mrb[12].mxu0  ;;  %1546 = vmatpush1.bf16.msra.mxu0 %v1545_v4  ;;  %1600 = vmatpush1.bf16.msra.mxu1 %v1545_v4 }
  0xf9   :  { %v485_v11 = vadd.f32 %v1496_v9, %v164_v34  ;;  %v479_v12 = vpop.f32.mrb[13].mxu0  ;;  %1547 = vmatprep.subr.bf16.mxu0 %v1617_v29  ;;  %1585 = vmatprep.subr.bf16.mxu1 %v1617_v29 }
  0xfa   :  { %v1548_v13 = vpack.c.bf16 %v589_v6, %v588_v8  ;;  %v480_v14 = vadd.f32 %v479_v12, %v159_v37 }
  0xfb   :  { %v591_v15 = vmax.f32 %v485_v11, 0.0 }
  0xfc   :  { %v590_v16 = vmax.f32 %v480_v14, 0.0  ;;  %v1499_v17 = vpop.f32.mrb[14].mxu0  ;;  %1549 = vmatpush1.bf16.msra.mxu0 %v1548_v13  ;;  %1601 = vmatpush1.bf16.msra.mxu1 %v1548_v13 }
  0xfd   :  { %v495_v18 = vadd.f32 %v1499_v17, %v174_v46  ;;  %v489_v19 = vpop.f32.mrb[15].mxu0  ;;  %1550 = vmatprep.subr.bf16.mxu0 %v1617_v29  ;;  %1586 = vmatprep.subr.bf16.mxu1 %v1617_v29  ;;  %v224_v46 = vpop.permute.xlu1 %223 }
  0xfe   :  { %v1551_v21 = vpack.c.bf16 %v591_v15, %v590_v16  ;;  %v490_v22 = vadd.f32 %v489_v19, %v169_v49  ;;  %v219_v49 = vpop.permute.xlu0 %218 }
  0xff   :  { %v593_v24 = vmax.f32 %v495_v18, 0.0 }
 0x100   :  { %v592_v25 = vmax.f32 %v490_v22, 0.0  ;;  %v1502_v26 = vpop.f32.mrb[16].mxu0  ;;  %1552 = vmatpush1.bf16.msra.mxu0 %v1551_v21  ;;  %1602 = vmatpush1.bf16.msra.mxu1 %v1551_v21 }
 0x101   :  { %v505_v27 = vadd.f32 %v1502_v26, %v184_v59  ;;  %v499_v28 = vpop.f32.mrb[17].mxu0  ;;  %1553 = vmatprep.subr.bf16.mxu0 %v1617_v29  ;;  %1587 = vmatprep.subr.bf16.mxu1 %v1617_v29  ;;  %v234_v58 = vpop.permute.xlu1 %233 }
 0x102   :  { %v1554_v30 = vpack.c.bf16 %v593_v24, %v592_v25  ;;  %v500_v31 = vadd.f32 %v499_v28, %v179_v62  ;;  %v229_v61 = vpop.permute.xlu0 %228 }
 0x103   :  { %v595_v32 = vmax.f32 %v505_v27, 0.0 }
 0x104   :  { %v594_v34 = vmax.f32 %v500_v31, 0.0  ;;  %v1505_v35 = vpop.f32.mrb[18].mxu0  ;;  %1555 = vmatpush1.bf16.msra.mxu0 %v1554_v30  ;;  %1603 = vmatpush1.bf16.msra.mxu1 %v1554_v30  ;;  %v610_v31 = vld [vmem:[%s2478_s3] sm:$0xff] }
 0x105   :  { %v515_v37 = vadd.f32 %v1505_v35, %v194_v7  ;;  %v509_v38 = vpop.f32.mrb[19].mxu0  ;;  %1556 = vmatprep.subr.bf16.mxu0 %v1617_v29  ;;  %1588 = vmatprep.subr.bf16.mxu1 %v1617_v29  ;;  %v244_v7 = vpop.permute.xlu1 %243  ;;  %v642_v35 = vld [vmem:[%s2478_s3 + $0x100] sm:$0xff] }
 0x106   :  { %v1557_v39 = vpack.c.bf16 %v595_v32, %v594_v34  ;;  %v510_v40 = vadd.f32 %v509_v38, %v189_v10  ;;  %v239_v10 = vpop.permute.xlu0 %238  ;;  %v640_v32 = vld [vmem:[%s2478_s3 + $0xf0] sm:$0xff]  ;;  %v643_v34 = vld [vmem:[%s2478_s3 + $0x108] sm:$0xff]  ;;  %v614_v38 = vld [vmem:[%s2478_s3 + $0x20] sm:$0xff] }
 0x107   :  { %v597_v41 = vmax.f32 %v515_v37, 0.0  ;;  %v645_v37 = vld [vmem:[%s2478_s3 + $0x118] sm:$0xff] }
 0x108   :  { %v596_v42 = vmax.f32 %v510_v40, 0.0  ;;  %v1508_v43 = vpop.f32.mrb[20].mxu0  ;;  %1558 = vmatpush1.bf16.msra.mxu0 %v1557_v39  ;;  %1604 = vmatpush1.bf16.msra.mxu1 %v1557_v39  ;;  %v644_v39 = vld [vmem:[%s2478_s3 + $0x110] sm:$0xff]  ;;  %v617_v40 = vld [vmem:[%s2478_s3 + $0x38] sm:$0xff] }
 0x109   :  { %v525_v44 = vadd.f32 %v1508_v43, %v204_v20  ;;  %v519_v45 = vpop.f32.mrb[21].mxu0  ;;  %1559 = vmatprep.subr.bf16.mxu0 %v1617_v29  ;;  %1589 = vmatprep.subr.bf16.mxu1 %v1617_v29  ;;  %v254_v19 = vpop.permute.xlu1 %253  ;;  %v646_v43 = vld [vmem:[%s2478_s3 + $0x120] sm:$0xff] }
 0x10a   :  { %v1560_v47 = vpack.c.bf16 %v597_v41, %v596_v42  ;;  %v520_v48 = vadd.f32 %v519_v45, %v199_v23  ;;  %v249_v22 = vpop.permute.xlu0 %248  ;;  %v647_v41 = vld [vmem:[%s2478_s3 + $0x128] sm:$0xff]  ;;  %v616_v42 = vld [vmem:[%s2478_s3 + $0x30] sm:$0xff]  ;;  %v649_v45 = vld [vmem:[%s2478_s3 + $0x138] sm:$0xff] }
 0x10b   :  { %v599_v50 = vmax.f32 %v525_v44, 0.0  ;;  %v619_v44 = vld [vmem:[%s2478_s3 + $0x48] sm:$0xff] }
 0x10c   :  { %v598_v51 = vmax.f32 %v520_v48, 0.0  ;;  %v1511_v52 = vpop.f32.mrb[22].mxu0  ;;  %1561 = vmatpush1.bf16.msra.mxu0 %v1560_v47  ;;  %1605 = vmatpush1.bf16.msra.mxu1 %v1560_v47  ;;  %v648_v47 = vld [vmem:[%s2478_s3 + $0x130] sm:$0xff]  ;;  %v621_v48 = vld [vmem:[%s2478_s3 + $0x58] sm:$0xff] }
 0x10d   :  { %v535_v53 = vadd.f32 %v1511_v52, %v214_v33  ;;  %v529_v54 = vpop.f32.mrb[23].mxu0  ;;  %1562 = vmatprep.subr.bf16.mxu0 %v1617_v29  ;;  %1590 = vmatprep.subr.bf16.mxu1 %v1617_v29  ;;  %v613_v33 = vld [vmem:[%s2478_s3 + $0x18] sm:$0xff]  ;;  %v623_v52 = vld [vmem:[%s2478_s3 + $0x68] sm:$0xff] }
 0x10e   :  { %v1563_v55 = vpack.c.bf16 %v599_v50, %v598_v51  ;;  %v530_v56 = vadd.f32 %v529_v54, %v209_v36  ;;  %v615_v36 = vld [vmem:[%s2478_s3 + $0x28] sm:$0xff]  ;;  %v620_v50 = vld [vmem:[%s2478_s3 + $0x50] sm:$0xff]  ;;  %v650_v51 = vld [vmem:[%s2478_s3 + $0x140] sm:$0xff] }
 0x10f   :  { %v601_v57 = vmax.f32 %v535_v53, 0.0  ;;  %v653_v53 = vld [vmem:[%s2478_s3 + $0x158] sm:$0xff]  ;;  %v622_v54 = vld [vmem:[%s2478_s3 + $0x60] sm:$0xff] }
 0x110   :  { %v600_v59 = vmax.f32 %v530_v56, 0.0  ;;  %v1514_v60 = vpop.f32.mrb[24].mxu0  ;;  %1564 = vmatpush1.bf16.msra.mxu0 %v1563_v55  ;;  %1606 = vmatpush1.bf16.msra.mxu1 %v1563_v55  ;;  %v652_v55 = vld [vmem:[%s2478_s3 + $0x150] sm:$0xff]  ;;  %v625_v56 = vld [vmem:[%s2478_s3 + $0x78] sm:$0xff] }
 0x111   :  { %v545_v62 = vadd.f32 %v1514_v60, %v224_v46  ;;  %v539_v63 = vpop.f32.mrb[25].mxu0  ;;  %1565 = vmatprep.subr.bf16.mxu0 %v1617_v29  ;;  %1591 = vmatprep.subr.bf16.mxu1 %v1617_v29  ;;  %v618_v46 = vld [vmem:[%s2478_s3 + $0x40] sm:$0xff]  ;;  %v627_v60 = vld [vmem:[%s2478_s3 + $0x88] sm:$0xff] }
 0x112   :  { %v1566_v0 = vpack.c.bf16 %v601_v57, %v600_v59  ;;  %v540_v1 = vadd.f32 %v539_v63, %v219_v49  ;;  %v651_v49 = vld [vmem:[%s2478_s3 + $0x148] sm:$0xff]  ;;  %v654_v59 = vld [vmem:[%s2478_s3 + $0x160] sm:$0xff]  ;;  %v656_v63 = vld [vmem:[%s2478_s3 + $0x170] sm:$0xff] }
 0x113   :  { %v603_v2 = vmax.f32 %v545_v62, 0.0  ;;  %v655_v57 = vld [vmem:[%s2478_s3 + $0x168] sm:$0xff]  ;;  %v626_v62 = vld [vmem:[%s2478_s3 + $0x80] sm:$0xff] }
 0x114   :  { %v602_v3 = vmax.f32 %v540_v1, 0.0  ;;  %v1517_v4 = vpop.f32.mrb[26].mxu0  ;;  %1567 = vmatpush1.bf16.msra.mxu0 %v1566_v0  ;;  %1607 = vmatpush1.bf16.msra.mxu1 %v1566_v0  ;;  %v629_v0 = vld [vmem:[%s2478_s3 + $0x98] sm:$0xff]  ;;  %v659_v1 = vld [vmem:[%s2478_s3 + $0x188] sm:$0xff] }
 0x115   :  { %v555_v5 = vadd.f32 %v1517_v4, %v234_v58  ;;  %v549_v6 = vpop.f32.mrb[27].mxu0  ;;  %1568 = vmatprep.subr.bf16.mxu0 %v1617_v29  ;;  %1592 = vmatprep.subr.bf16.mxu1 %v1617_v29  ;;  %v624_v58 = vld [vmem:[%s2478_s3 + $0x70] sm:$0xff]  ;;  %v631_v4 = vld [vmem:[%s2478_s3 + $0xa8] sm:$0xff] }
 0x116   :  { %v1569_v8 = vpack.c.bf16 %v603_v2, %v602_v3  ;;  %v550_v9 = vadd.f32 %v549_v6, %v229_v61  ;;  %v657_v61 = vld [vmem:[%s2478_s3 + $0x178] sm:$0xff]  ;;  %v628_v2 = vld [vmem:[%s2478_s3 + $0x90] sm:$0xff]  ;;  %v658_v3 = vld [vmem:[%s2478_s3 + $0x180] sm:$0xff] }
 0x117   :  { %v605_v11 = vmax.f32 %v555_v5, 0.0  ;;  %v661_v5 = vld [vmem:[%s2478_s3 + $0x198] sm:$0xff]  ;;  %v630_v6 = vld [vmem:[%s2478_s3 + $0xa0] sm:$0xff] }
 0x118   :  { %v604_v12 = vmax.f32 %v550_v9, 0.0  ;;  %v1520_v13 = vpop.f32.mrb[28].mxu0  ;;  %1570 = vmatpush1.bf16.msra.mxu0 %v1569_v8  ;;  %1608 = vmatpush1.bf16.msra.mxu1 %v1569_v8  ;;  %v633_v8 = vld [vmem:[%s2478_s3 + $0xb8] sm:$0xff]  ;;  %v663_v9 = vld [vmem:[%s2478_s3 + $0x1a8] sm:$0xff] }
 0x119   :  { %v565_v14 = vadd.f32 %v1520_v13, %v244_v7  ;;  %v559_v15 = vpop.f32.mrb[29].mxu0  ;;  %1571 = vmatprep.subr.bf16.mxu0 %v1617_v29  ;;  %1593 = vmatprep.subr.bf16.mxu1 %v1617_v29  ;;  %v660_v7 = vld [vmem:[%s2478_s3 + $0x190] sm:$0xff]  ;;  %v665_v13 = vld [vmem:[%s2478_s3 + $0x1b8] sm:$0xff] }
 0x11a   :  { %v1572_v16 = vpack.c.bf16 %v605_v11, %v604_v12  ;;  %v560_v17 = vadd.f32 %v559_v15, %v239_v10  ;;  %v632_v10 = vld [vmem:[%s2478_s3 + $0xb0] sm:$0xff]  ;;  %v662_v11 = vld [vmem:[%s2478_s3 + $0x1a0] sm:$0xff]  ;;  %v635_v12 = vld [vmem:[%s2478_s3 + $0xc8] sm:$0xff] }
 0x11b   :  { %v607_v18 = vmax.f32 %v565_v14, 0.0  ;;  %v634_v14 = vld [vmem:[%s2478_s3 + $0xc0] sm:$0xff]  ;;  %v664_v15 = vld [vmem:[%s2478_s3 + $0x1b0] sm:$0xff] }
 0x11c   :  { %v606_v20 = vmax.f32 %v560_v17, 0.0  ;;  %v1523_v21 = vpop.f32.mrb[30].mxu0  ;;  %1573 = vmatpush1.bf16.msra.mxu0 %v1572_v16  ;;  %1609 = vmatpush1.bf16.msra.mxu1 %v1572_v16  ;;  %v637_v16 = vld [vmem:[%s2478_s3 + $0xd8] sm:$0xff]  ;;  %v667_v17 = vld [vmem:[%s2478_s3 + $0x1c8] sm:$0xff] }
 0x11d   :  { %v575_v23 = vadd.f32 %v1523_v21, %v254_v19  ;;  %v569_v24 = vpop.f32.mrb[31].mxu0  ;;  %1574 = vmatprep.subr.bf16.mxu0 %v1617_v29  ;;  %1594 = vmatprep.subr.bf16.mxu1 %v1617_v29  ;;  %v666_v19 = vld [vmem:[%s2478_s3 + $0x1c0] sm:$0xff]  ;;  %v669_v21 = vld [vmem:[%s2478_s3 + $0x1d8] sm:$0xff] }
 0x11e   :  { %v1575_v25 = vpack.c.bf16 %v607_v18, %v606_v20  ;;  %v570_v26 = vadd.f32 %v569_v24, %v249_v22  ;;  %v636_v18 = vld [vmem:[%s2478_s3 + $0xd0] sm:$0xff]  ;;  %v639_v20 = vld [vmem:[%s2478_s3 + $0xe8] sm:$0xff]  ;;  %v638_v22 = vld [vmem:[%s2478_s3 + $0xe0] sm:$0xff] }
 0x11f   :  { %v609_v27 = vmax.f32 %v575_v23, 0.0  ;;  %v668_v23 = vld [vmem:[%s2478_s3 + $0x1d0] sm:$0xff]  ;;  %v671_v24 = vld [vmem:[%s2478_s3 + $0x1e8] sm:$0xff] }
 0x120   :  { %v608_v28 = vmax.f32 %v570_v26, 0.0  ;;  %1576 = vmatpush1.bf16.msra.mxu0 %v1575_v25  ;;  %1610 = vmatpush1.bf16.msra.mxu1 %v1575_v25  ;;  %v670_v25 = vld [vmem:[%s2478_s3 + $0x1e0] sm:$0xff]  ;;  %v673_v26 = vld [vmem:[%s2478_s3 + $0x1f8] sm:$0xff] }
 0x121   :  { %1577 = vmatprep.subr.bf16.mxu0 %v1617_v29  ;;  %1595 = vmatprep.subr.bf16.mxu1 %v1617_v29  ;;  %v612_v29 = vld [vmem:[%s2478_s3 + $0x10] sm:$0xff] }
 0x122   :  { %v1578_v30 = vpack.c.bf16 %v609_v27, %v608_v28  ;;  %v672_v27 = vld [vmem:[%s2478_s3 + $0x1f0] sm:$0xff]  ;;  %v709_v28 = vpop.permute.xlu0 %708 }
 0x124   :  { %1579 = vmatpush1.bf16.msra.mxu0 %v1578_v30  ;;  %1611 = vmatpush1.bf16.msra.mxu1 %v1578_v30  ;;  %v714_v30 = vpop.permute.xlu1 %713 }
 0x127   :  { %931 = vmatmul.mubr.f32.vlgmr.msra.gmra.mrb[32].mxu0 %v610_v31  ;;  %1006 = vmatmul.mubr.f32.vlgmr.msra.gmra.mrb[0].mxu1 %v640_v32  ;;  %v719_v31 = vpop.permute.xlu0 %718 }
 0x128   :  { %935 = vmatprep.mubr.f32.mxu0 %v613_v33  ;;  %1010 = vmatprep.mubr.f32.mxu1 %v643_v34  ;;  %v724_v32 = vpop.permute.xlu1 %723 }
 0x12b   :  { %936 = vmatmul.mubr.f32.gmra.mrb[34].mxu0 %v612_v29  ;;  %1011 = vmatmul.mubr.f32.gmra.mrb[2].mxu1 %v642_v35  ;;  %v2313_v33 = vpop.permute.xlu0 %728 }
 0x12c   :  { %940 = vmatprep.mubr.f32.mxu0 %v615_v36  ;;  %1015 = vmatprep.mubr.f32.mxu1 %v645_v37  ;;  %v2315_v34 = vpop.permute.xlu1 %733 }
 0x12f   :  { %941 = vmatmul.mubr.f32.gmra.mrb[36].mxu0 %v614_v38  ;;  %1016 = vmatmul.mubr.f32.gmra.mrb[4].mxu1 %v644_v39  ;;  %v2317_v29 = vpop.permute.xlu0 %738 }
 0x130   :  { %945 = vmatprep.mubr.f32.mxu0 %v617_v40  ;;  %1020 = vmatprep.mubr.f32.mxu1 %v647_v41  ;;  %v2319_v35 = vpop.permute.xlu1 %743 }
 0x133   :  { %946 = vmatmul.mubr.f32.gmra.mrb[38].mxu0 %v616_v42  ;;  %1021 = vmatmul.mubr.f32.gmra.mrb[6].mxu1 %v646_v43  ;;  %v2321_v36 = vpop.permute.xlu0 %748 }
 0x134   :  { %950 = vmatprep.mubr.f32.mxu0 %v619_v44  ;;  %1025 = vmatprep.mubr.f32.mxu1 %v649_v45  ;;  %v2323_v37 = vpop.permute.xlu1 %753 }
 0x137   :  { %951 = vmatmul.mubr.f32.gmra.mrb[40].mxu0 %v618_v46  ;;  %1026 = vmatmul.mubr.f32.gmra.mrb[8].mxu1 %v648_v47  ;;  %v2325_v38 = vpop.permute.xlu0 %758 }
 0x138   :  { %955 = vmatprep.mubr.f32.mxu0 %v621_v48  ;;  %1030 = vmatprep.mubr.f32.mxu1 %v651_v49  ;;  %v2327_v39 = vpop.permute.xlu1 %763 }
 0x13b   :  { %956 = vmatmul.mubr.f32.gmra.mrb[42].mxu0 %v620_v50  ;;  %1031 = vmatmul.mubr.f32.gmra.mrb[10].mxu1 %v650_v51  ;;  %v2329_v40 = vpop.permute.xlu0 %768 }
 0x13c   :  { %960 = vmatprep.mubr.f32.mxu0 %v623_v52  ;;  %1035 = vmatprep.mubr.f32.mxu1 %v653_v53  ;;  %v2331_v41 = vpop.permute.xlu1 %773 }
 0x13f   :  { %961 = vmatmul.mubr.f32.gmra.mrb[44].mxu0 %v622_v54  ;;  %1036 = vmatmul.mubr.f32.gmra.mrb[12].mxu1 %v652_v55  ;;  %v2333_v42 = vpop.permute.xlu0 %778 }
 0x140   :  { %965 = vmatprep.mubr.f32.mxu0 %v625_v56  ;;  %1040 = vmatprep.mubr.f32.mxu1 %v655_v57  ;;  %v2335_v43 = vpop.permute.xlu1 %783 }
 0x143   :  { %966 = vmatmul.mubr.f32.gmra.mrb[46].mxu0 %v624_v58  ;;  %1041 = vmatmul.mubr.f32.gmra.mrb[14].mxu1 %v654_v59  ;;  %v2337_v44 = vpop.permute.xlu0 %788 }
 0x144   :  { %970 = vmatprep.mubr.f32.mxu0 %v627_v60  ;;  %1045 = vmatprep.mubr.f32.mxu1 %v657_v61  ;;  %v2339_v45 = vpop.permute.xlu1 %793 }
 0x147   :  { %971 = vmatmul.mubr.f32.gmra.mrb[48].mxu0 %v626_v62  ;;  %1046 = vmatmul.mubr.f32.gmra.mrb[16].mxu1 %v656_v63  ;;  %v2341_v46 = vpop.permute.xlu0 %798 }
 0x148   :  { %975 = vmatprep.mubr.f32.mxu0 %v629_v0  ;;  %1050 = vmatprep.mubr.f32.mxu1 %v659_v1  ;;  %v2343_v47 = vpop.permute.xlu1 %803 }
 0x14b   :  { %976 = vmatmul.mubr.f32.gmra.mrb[50].mxu0 %v628_v2  ;;  %1051 = vmatmul.mubr.f32.gmra.mrb[18].mxu1 %v658_v3  ;;  %v2345_v48 = vpop.permute.xlu0 %808 }
 0x14c   :  { %980 = vmatprep.mubr.f32.mxu0 %v631_v4  ;;  %1055 = vmatprep.mubr.f32.mxu1 %v661_v5  ;;  %v2347_v49 = vpop.permute.xlu1 %813 }
 0x14f   :  { %981 = vmatmul.mubr.f32.gmra.mrb[52].mxu0 %v630_v6  ;;  %1056 = vmatmul.mubr.f32.gmra.mrb[20].mxu1 %v660_v7  ;;  %v2349_v50 = vpop.permute.xlu0 %818 }
 0x150   :  { %985 = vmatprep.mubr.f32.mxu0 %v633_v8  ;;  %1060 = vmatprep.mubr.f32.mxu1 %v663_v9  ;;  %v2351_v51 = vpop.permute.xlu1 %823 }
 0x153   :  { %986 = vmatmul.mubr.f32.gmra.mrb[54].mxu0 %v632_v10  ;;  %1061 = vmatmul.mubr.f32.gmra.mrb[22].mxu1 %v662_v11  ;;  %v2353_v52 = vpop.permute.xlu0 %828 }
 0x154   :  { %990 = vmatprep.mubr.f32.mxu0 %v635_v12  ;;  %1065 = vmatprep.mubr.f32.mxu1 %v665_v13  ;;  %v2355_v53 = vpop.permute.xlu1 %833 }
 0x157   :  { %991 = vmatmul.mubr.f32.gmra.mrb[56].mxu0 %v634_v14  ;;  %1066 = vmatmul.mubr.f32.gmra.mrb[24].mxu1 %v664_v15  ;;  %v2357_v54 = vpop.permute.xlu0 %838 }
 0x158   :  { %995 = vmatprep.mubr.f32.mxu0 %v637_v16  ;;  %1070 = vmatprep.mubr.f32.mxu1 %v667_v17  ;;  %v2359_v55 = vpop.permute.xlu1 %843 }
 0x15b   :  { %996 = vmatmul.mubr.f32.gmra.mrb[58].mxu0 %v636_v18  ;;  %1071 = vmatmul.mubr.f32.gmra.mrb[26].mxu1 %v666_v19  ;;  %v2361_v56 = vpop.permute.xlu0 %848 }
 0x15c   :  { %1000 = vmatprep.mubr.f32.mxu0 %v639_v20  ;;  %1075 = vmatprep.mubr.f32.mxu1 %v669_v21  ;;  %v2363_v57 = vpop.permute.xlu1 %853 }
 0x15f   :  { %1001 = vmatmul.mubr.f32.gmra.mrb[60].mxu0 %v638_v22  ;;  %1076 = vmatmul.mubr.f32.gmra.mrb[28].mxu1 %v668_v23  ;;  %v1158_v58 = vpop.permute.xlu0 %1157 }
 0x160   :  { %1080 = vmatprep.mubr.f32.mxu1 %v671_v24  ;;  %v1163_v59 = vpop.permute.xlu1 %1162 }
 0x163   :  { %1081 = vmatmul.mubr.f32.gmra.mrb[30].mxu1 %v670_v25  ;;  %v1168_v60 = vpop.permute.xlu0 %1167 }
 0x164   :  { %1085 = vmatprep.mubr.f32.mxu1 %v673_v26  ;;  %v1173_v61 = vpop.permute.xlu1 %1172 }
 0x167   :  { %1086 = vmatmul.mubr.f32.gmra.mrb[32].mxu1 %v672_v27  ;;  %v1178_v62 = vpop.permute.xlu0 %1177 }
 0x168   :  { %v1183_v63 = vpop.permute.xlu1 %1182 }
 0x16b   :  { %v2365_v0 = vpop.permute.xlu0 %1187 }
 0x16c   :  { %v2369_v6 = vpop.permute.xlu1 %1192 }
 0x16f   :  { %v2373_v13 = vpop.permute.xlu0 %1197 }
 0x170   :  { %v2377_v22 = vpop.permute.xlu1 %1202 }
 0x1fa   :  { %v932_v1 = vpop.f32.mrb[32].mxu0  ;;  %v2367_v2 = vpop.f32.mrb[0].mxu1 }
 0x1fb   :  { %v933_v3 = vadd.f32 %v932_v1, %v709_v28  ;;  %v934_v4 = vpop.f32.mrb[33].mxu0  ;;  %v1009_v5 = vpop.f32.mrb[1].mxu1 }
 0x1fd   :  { %v1091_v9 = vmax.f32 %v933_v3, 0.0  ;;  %v2381_v3 = vpop.permute.xlu0 %1207 }
 0x1fe   :  { %v937_v7 = vpop.f32.mrb[34].mxu0  ;;  %v2371_v8 = vpop.f32.mrb[2].mxu1 }
 0x1ff   :  { %v938_v10 = vadd.f32 %v937_v7, %v714_v30  ;;  %v939_v11 = vpop.f32.mrb[35].mxu0  ;;  %v1014_v12 = vpop.f32.mrb[3].mxu1  ;;  %v1315_v17 = vmul.f32 %v1158_v58, %v1091_v9 }
 0x200   :  { %v2386_v11 = vpop.permute.xlu1 %1212 }
 0x201   :  { %v1092_v14 = vmax.f32 %v938_v10, 0.0 }
 0x202   :  { %v942_v15 = vpop.f32.mrb[36].mxu0  ;;  %v2375_v16 = vpop.f32.mrb[4].mxu1 }
 0x203   :  { %v1316_v18 = vmul.f32 %v1163_v59, %v1092_v14  ;;  %v943_v19 = vadd.f32 %v942_v15, %v719_v31  ;;  %v944_v20 = vpop.f32.mrb[37].mxu0  ;;  %v1019_v21 = vpop.f32.mrb[5].mxu1 }
 0x204   :  { %v2391_v20 = vpop.permute.xlu0 %1217 }
 0x205   :  { %v1347_v23 = vadd.f32 %v1316_v18, %v1315_v17  ;;  %v1093_v24 = vmax.f32 %v943_v19, 0.0 }
 0x206   :  { %v947_v25 = vpop.f32.mrb[38].mxu0  ;;  %v2379_v26 = vpop.f32.mrb[6].mxu1 }
 0x207   :  { %v1317_v27 = vmul.f32 %v1168_v60, %v1093_v24  ;;  %v948_v28 = vadd.f32 %v947_v25, %v724_v32  ;;  %v949_v30 = vpop.f32.mrb[39].mxu0  ;;  %v1024_v1 = vpop.f32.mrb[7].mxu1 }
 0x208   :  { %v2396_v30 = vpop.permute.xlu1 %1222 }
 0x209   :  { %v1348_v4 = vadd.f32 %v1347_v23, %v1317_v27  ;;  %v1094_v5 = vmax.f32 %v948_v28, 0.0 }
 0x20a   :  { %v952_v58 = vpop.f32.mrb[40].mxu0  ;;  %v2383_v59 = vpop.f32.mrb[8].mxu1 }
 0x20b   :  { %v1318_v31 = vmul.f32 %v1173_v61, %v1094_v5  ;;  %v953_v7 = vadd.f32 %v952_v58, %v2313_v33  ;;  %v954_v9 = vpop.f32.mrb[41].mxu0  ;;  %v1029_v10 = vpop.f32.mrb[9].mxu1 }
 0x20c   :  { %v2402_v9 = vpop.permute.xlu0 %1227 }
 0x20d   :  { %v1349_v12 = vadd.f32 %v1348_v4, %v1318_v31  ;;  %v1095_v14 = vmax.f32 %v953_v7, 0.0 }
 0x20e   :  { %v957_v60 = vpop.f32.mrb[42].mxu0  ;;  %v2388_v32 = vpop.f32.mrb[10].mxu1 }
 0x20f   :  { %v1319_v15 = vmul.f32 %v1178_v62, %v1095_v14  ;;  %v958_v17 = vadd.f32 %v957_v60, %v2315_v34  ;;  %v959_v18 = vpop.f32.mrb[43].mxu0  ;;  %v1034_v19 = vpop.f32.mrb[11].mxu1 }
 0x210   :  { %v2408_v18 = vpop.permute.xlu1 %1232 }
 0x211   :  { %v1350_v21 = vadd.f32 %v1349_v12, %v1319_v15  ;;  %v1096_v61 = vmax.f32 %v958_v17, 0.0 }
 0x212   :  { %v962_v23 = vpop.f32.mrb[44].mxu0  ;;  %v2393_v33 = vpop.f32.mrb[12].mxu1 }
 0x213   :  { %v1320_v24 = vmul.f32 %v1183_v63, %v1096_v61  ;;  %v963_v25 = vadd.f32 %v962_v23, %v2317_v29  ;;  %v964_v27 = vpop.f32.mrb[45].mxu0  ;;  %v1039_v28 = vpop.f32.mrb[13].mxu1 }
 0x214   :  { %v2414_v27 = vpop.permute.xlu0 %1237 }
 0x215   :  { %v1351_v1 = vadd.f32 %v1350_v21, %v1320_v24  ;;  %v1097_v62 = vmax.f32 %v963_v25, 0.0 }
 0x216   :  { %v967_v4 = vpop.f32.mrb[46].mxu0  ;;  %v2398_v34 = vpop.f32.mrb[14].mxu1 }
 0x217   :  { %v1321_v5 = vmul.f32 %v2365_v0, %v1097_v62  ;;  %v968_v58 = vadd.f32 %v967_v4, %v2319_v35  ;;  %v969_v31 = vpop.f32.mrb[47].mxu0  ;;  %v1044_v7 = vpop.f32.mrb[15].mxu1 }
 0x218   :  { %v1243_v31 = vpop.permute.xlu1 %1242 }
 0x219   :  { %v1352_v63 = vadd.f32 %v1351_v1, %v1321_v5  ;;  %v1098_v10 = vmax.f32 %v968_v58, 0.0 }
 0x21a   :  { %v972_v29 = vpop.f32.mrb[48].mxu0  ;;  %v2404_v12 = vpop.f32.mrb[16].mxu1 }
 0x21b   :  { %v1322_v14 = vmul.f32 %v2369_v6, %v1098_v10  ;;  %v973_v60 = vadd.f32 %v972_v29, %v2321_v36  ;;  %v974_v15 = vpop.f32.mrb[49].mxu0  ;;  %v1049_v17 = vpop.f32.mrb[17].mxu1 }
 0x21c   :  { %v1248_v15 = vpop.permute.xlu0 %1247 }
 0x21d   :  { %v1353_v0 = vadd.f32 %v1352_v63, %v1322_v14  ;;  %v1099_v19 = vmax.f32 %v973_v60, 0.0 }
 0x21e   :  { %v977_v35 = vpop.f32.mrb[50].mxu0  ;;  %v2410_v21 = vpop.f32.mrb[18].mxu1 }
 0x21f   :  { %v1323_v61 = vmul.f32 %v2373_v13, %v1099_v19  ;;  %v978_v23 = vadd.f32 %v977_v35, %v2323_v37  ;;  %v979_v24 = vpop.f32.mrb[51].mxu0  ;;  %v1054_v25 = vpop.f32.mrb[19].mxu1 }
 0x220   :  { %v1253_v24 = vpop.permute.xlu1 %1252 }
 0x221   :  { %v1354_v6 = vadd.f32 %v1353_v0, %v1323_v61  ;;  %v1100_v28 = vmax.f32 %v978_v23, 0.0 }
 0x222   :  { %v982_v36 = vpop.f32.mrb[52].mxu0  ;;  %v2416_v1 = vpop.f32.mrb[20].mxu1 }
 0x223   :  { %v1324_v62 = vmul.f32 %v2377_v22, %v1100_v28  ;;  %v983_v4 = vadd.f32 %v982_v36, %v2325_v38  ;;  %v984_v5 = vpop.f32.mrb[53].mxu0  ;;  %v1059_v58 = vpop.f32.mrb[21].mxu1 }
 0x224   :  { %v1258_v5 = vpop.permute.xlu0 %1257 }
 0x225   :  { %v1355_v7 = vadd.f32 %v1354_v6, %v1324_v62  ;;  %v1101_v13 = vmax.f32 %v983_v4, 0.0 }
 0x226   :  { %v987_v63 = vpop.f32.mrb[54].mxu0  ;;  %v2420_v37 = vpop.f32.mrb[22].mxu1 }
 0x227   :  { %v1325_v10 = vmul.f32 %v2381_v3, %v1101_v13  ;;  %v988_v29 = vadd.f32 %v987_v63, %v2327_v39  ;;  %v989_v14 = vpop.f32.mrb[55].mxu0  ;;  %v1064_v60 = vpop.f32.mrb[23].mxu1  ;;  %v1013_v63 = vadd.f32 %v2371_v8, %v2337_v44 }
 0x228   :  { %v1263_v14 = vpop.permute.xlu1 %1262 }
 0x229   :  { %v1356_v17 = vadd.f32 %v1355_v7, %v1325_v10  ;;  %v1102_v0 = vmax.f32 %v988_v29, 0.0 }
 0x22a   :  { %v992_v22 = vpop.f32.mrb[56].mxu0  ;;  %v2424_v19 = vpop.f32.mrb[24].mxu1 }
 0x22b   :  { %v1326_v38 = vmul.f32 %v2386_v11, %v1102_v0  ;;  %v993_v35 = vadd.f32 %v992_v22, %v2329_v40  ;;  %v994_v61 = vpop.f32.mrb[57].mxu0  ;;  %v1069_v23 = vpop.f32.mrb[25].mxu1  ;;  %v1008_v11 = vadd.f32 %v2367_v2, %v2335_v43  ;;  %v1107_v22 = vmax.f32 %v1013_v63, 0.0 }
 0x22c   :  { %v1028_v61 = vadd.f32 %v2383_v59, %v2343_v47  ;;  %v1043_v59 = vadd.f32 %v2398_v34, %v2349_v50  ;;  %v1058_v50 = vadd.f32 %v2416_v1, %v2355_v53 }
 0x22d   :  { %v1357_v25 = vadd.f32 %v1356_v17, %v1326_v38  ;;  %v1103_v6 = vmax.f32 %v993_v35, 0.0  ;;  %v1106_v60 = vmax.f32 %v1008_v11, 0.0  ;;  %v1018_v17 = vadd.f32 %v2375_v16, %v2339_v45 }
 0x22e   :  { %v997_v3 = vpop.f32.mrb[58].mxu0  ;;  %v2428_v28 = vpop.f32.mrb[26].mxu1  ;;  %v1023_v38 = vadd.f32 %v2379_v26, %v2341_v46  ;;  %v1331_v16 = vmul.f32 %v2414_v27, %v1107_v22 }
 0x22f   :  { %v1327_v39 = vmul.f32 %v2391_v20, %v1103_v6  ;;  %v998_v36 = vadd.f32 %v997_v3, %v2331_v41  ;;  %v999_v62 = vpop.f32.mrb[59].mxu0  ;;  %v1074_v4 = vpop.f32.mrb[27].mxu1  ;;  %v1108_v35 = vmax.f32 %v1018_v17, 0.0  ;;  %v1033_v3 = vadd.f32 %v2388_v32, %v2345_v48 }
 0x230   :  { %v1109_v6 = vmax.f32 %v1023_v38, 0.0  ;;  %v1048_v48 = vadd.f32 %v2404_v12, %v2351_v51  ;;  %v1063_v51 = vadd.f32 %v2420_v37, %v2357_v54  ;;  %v1073_v53 = vadd.f32 %v2428_v28, %v2361_v56 }
 0x231   :  { %v1358_v58 = vadd.f32 %v1357_v25, %v1327_v39  ;;  %v1104_v40 = vmax.f32 %v998_v36, 0.0  ;;  %v1273_v25 = vpop.permute.xlu1 %1272  ;;  %v1110_v39 = vmax.f32 %v1028_v61, 0.0  ;;  %v1111_v47 = vmax.f32 %v1033_v3, 0.0 }
 0x232   :  { %v1002_v7 = vpop.f32.mrb[60].mxu0  ;;  %v2434_v13 = vpop.f32.mrb[28].mxu1  ;;  %v1333_v4 = vmul.f32 %v1248_v15, %v1109_v6  ;;  %v1117_v17 = vmax.f32 %v1063_v51, 0.0 }
 0x233   :  { %v1328_v10 = vmul.f32 %v2396_v30, %v1104_v40  ;;  %v1003_v20 = vadd.f32 %v1002_v7, %v2333_v42  ;;  %v1004_v29 = vpop.f32.mrb[61].mxu0  ;;  %v1079_v41 = vpop.f32.mrb[29].mxu1  ;;  %v1330_v42 = vmul.f32 %v2408_v18, %v1106_v60  ;;  %v1038_v18 = vadd.f32 %v2393_v33, %v2347_v49 }
 0x234   :  { %v1268_v30 = vpop.permute.xlu0 %1267  ;;  %v1113_v7 = vmax.f32 %v1043_v59, 0.0  ;;  %v1053_v49 = vadd.f32 %v2410_v21, %v2353_v52  ;;  %v1116_v41 = vmax.f32 %v1058_v50, 0.0  ;;  %v1068_v52 = vadd.f32 %v2424_v19, %v2359_v55 }
 0x235   :  { %v1359_v43 = vadd.f32 %v1358_v58, %v1328_v10  ;;  %v1105_v2 = vmax.f32 %v1003_v20, 0.0  ;;  %v1283_v27 = vpop.permute.xlu1 %1282  ;;  %v1334_v58 = vmul.f32 %v1253_v24, %v1110_v39  ;;  %v1112_v40 = vmax.f32 %v1038_v18, 0.0 }
 0x236   :  { %v1082_v0 = vpop.f32.mrb[30].mxu1  ;;  %v1114_v10 = vmax.f32 %v1048_v48, 0.0  ;;  %v1337_v24 = vmul.f32 %v1268_v30, %v1113_v7  ;;  %v1115_v29 = vmax.f32 %v1053_v49, 0.0  ;;  %v1118_v22 = vmax.f32 %v1068_v52, 0.0 }
 0x237   :  { %v1329_v44 = vmul.f32 %v2402_v9, %v1105_v2  ;;  %v1084_v8 = vpop.f32.mrb[31].mxu1  ;;  %v1332_v9 = vmul.f32 %v1243_v31, %v1108_v35  ;;  %v1335_v31 = vmul.f32 %v1258_v5, %v1111_v47  ;;  %v1336_v15 = vmul.f32 %v1263_v14, %v1112_v40 }
 0x238   :  { %v1278_v62 = vpop.permute.xlu0 %1277  ;;  %v1338_v5 = vmul.f32 %v1273_v25, %v1114_v10  ;;  %v1340_v2 = vmul.f32 %v1283_v27, %v1116_v41  ;;  %v1078_v54 = vadd.f32 %v2434_v13, %v2363_v57  ;;  %v1390_v18 = vlaneseq }
 0x239   :  { %v1360_v23 = vadd.f32 %v1359_v43, %v1329_v44  ;;  %v1293_v20 = vpop.permute.xlu1 %1292  ;;  %v1339_v14 = vmul.f32 %v1278_v62, %v1115_v29  ;;  %v1119_v44 = vmax.f32 %v1073_v53, 0.0 }
 0x23a   :  { %v1087_v45 = vpop.f32.mrb[32].mxu1  ;;  %v1342_v19 = vmul.f32 %v1293_v20, %v1118_v22  ;;  %v1391_v62 = vshrl.u32 %v1390_v18, 7 }
 0x23b   :  { %v1361_v46 = vadd.f32 %v1360_v23, %v1330_v42  ;;  %v1089_v26 = vpop.f32.mrb[33].mxu1  ;;  %v1120_v42 = vmax.f32 %v1078_v54, 0.0 }
 0x23c   :  { %v1288_v63 = vpop.permute.xlu0 %1287 }
 0x23d   :  { %v1362_v36 = vadd.f32 %v1361_v46, %v1331_v16  ;;  %v1298_v43 = vpop.permute.xlu1 %1297  ;;  %v1341_v38 = vmul.f32 %v1288_v63, %v1117_v17 }
 0x23e   :  { %v1343_v25 = vmul.f32 %v1298_v43, %v1119_v44 }
 0x23f   :  { %v1363_v11 = vadd.f32 %v1362_v36, %v1332_v9 }
 0x240   :  { %v859_v60 = vpop.permute.xlu0 %858 }
 0x241   :  { %v1364_v32 = vadd.f32 %v1363_v11, %v1333_v4  ;;  %v1083_v30 = vadd.f32 %v1082_v0, %v859_v60  ;;  %v1303_v23 = vpop.permute.xlu1 %1302 }
 0x242   :  { %v1344_v16 = vmul.f32 %v1303_v23, %v1120_v42 }
 0x243   :  { %v1365_v33 = vadd.f32 %v1364_v32, %v1334_v58  ;;  %v1121_v28 = vmax.f32 %v1083_v30, 0.0 }
 0x244   :  { %v864_v55 = vpop.permute.xlu0 %863 }
 0x245   :  { %v1366_v34 = vadd.f32 %v1365_v33, %v1335_v31  ;;  %v1088_v61 = vadd.f32 %v1087_v45, %v864_v55  ;;  %v1313_v13 = vpop.permute.xlu1 %1312  ;;  %v1392_v45 = vsub.s32 0, %v1391_v62 }
 0x247   :  { %v1367_v12 = vadd.f32 %v1366_v34, %v1336_v15  ;;  %v1122_v3 = vmax.f32 %v1088_v61, 0.0 }
 0x248   :  { %v1308_v46 = vpop.permute.xlu0 %1307 }
 0x249   :  { %v1368_v21 = vadd.f32 %v1367_v12, %v1337_v24  ;;  %v1345_v57 = vmul.f32 %v1308_v46, %v1121_v28  ;;  %v1346_v39 = vmul.f32 %v1313_v13, %v1122_v3 }
 0x24b   :  { %v1369_v1 = vadd.f32 %v1368_v21, %v1338_v5 }
 0x24c   :  { %v1388_v11 = vpop.permute.xlu0 %1387 }
 0x24d   :  { %v1370_v37 = vadd.f32 %v1369_v1, %v1339_v14  ;;  %v1393_v58 = vrot.slane %v1388_v11, %v1392_v45 }
 0x24f   :  { %v1371_v8 = vadd.f32 %v1370_v37, %v1340_v2 }
 0x251   :  { %v1372_v35 = vadd.f32 %v1371_v8, %v1341_v38 }
 0x253   :  { %v1373_v56 = vadd.f32 %v1372_v35, %v1342_v19 }
 0x255   :  { %v1374_v6 = vadd.f32 %v1373_v56, %v1343_v25 }
 0x257   :  { %v1375_v26 = vadd.f32 %v1374_v6, %v1344_v16 }
 0x259   :  { %v1376_v9 = vadd.f32 %v1375_v26, %v1345_v57 }
 0x25b   :  { %v1377_v0 = vadd.f32 %v1376_v9, %v1346_v39 }
 0x25d   :  { %v1378_v36 = vrot.slane %v1377_v0, 4 }
 0x25f   :  { %v1379_v4 = vadd.f32 %v1378_v36, %v1377_v0 }
 0x261   :  { %v1380_v47 = vrot.slane %v1379_v4, 2 }
 0x263   :  { %v1381_v59 = vadd.f32 %v1380_v47, %v1379_v4 }
 0x265   :  { %v1382_v27 = vrot.slane %v1381_v59, 1 }
 0x267   :  { %v1383_v40 = vadd.f32 %v1382_v27, %v1381_v59 }
 0x269   :  { %v1394_v48 = vadd.f32 %v1393_v58, %v1383_v40 }
 0x26b   :  { %1395 = vst [vmem:[%s2479_s7] sm:$0x1] %v1394_v48 }

</bundles_post_ra>
